<compile_context>
chip_gen: v7x
topology: tpu7x:2x2x1
jax: 0.10.0
libtpu: 0.0.40
codegen_flags: <defaults>
</compile_context>

<pallas_src>
import functools

import jax
import jax.numpy as jnp
from jax.experimental import pallas as pl
from jax.experimental.pallas import tpu as pltpu

IGNORE_INDEX = -100   # PyTorch CrossEntropyLoss default
_LANE = 128


def _round_up(x, m):
    return ((x + m - 1) // m) * m


def _head_logits_kernel(h_ref, w_ref, b_ref, m_ref, logits_ref):
    """ClassificationHead only (inference path, labels is None), one N-tile."""
    dot = jnp.dot(h_ref[...], w_ref[...], preferred_element_type=jnp.float32)
    logits = m_ref[...] * dot + b_ref[...]
    logits_ref[...] = logits.astype(logits_ref.dtype)


def _head_ce_kernel(h_ref, w_ref, b_ref, m_ref, lab_ref, *out_refs,
                    n_rows, tile_m, num_labels, emit_logits):
    """Fused ClassificationHead (Linear) + CrossEntropyLoss partials, one N-tile.

    h_ref:   [TM, H]       bf16   hidden-state tile
    w_ref:   [H,  LPAD]    bf16   classifier weight (zero-padded cols, resident)
    b_ref:   [1,  LPAD]    f32    classifier bias   (zero-padded cols, resident)
    m_ref:   [TM, 1]       f32    attention-mask tile (fused backbone mask)
    lab_ref: [TM, 1]       int32  labels (-100 = ignore)
    out_refs: (logits_ref [TM, LPAD], part_ref [1, 2, LPAD]) or (part_ref,)
    """
    if emit_logits:
        logits_ref, part_ref = out_refs
    else:
        (part_ref,) = out_refs

    # Linear on the MXU: bf16 x bf16 -> f32 accumulate; mask folded in per row.
    dot = jnp.dot(h_ref[...], w_ref[...], preferred_element_type=jnp.float32)
    logits = m_ref[...] * dot + b_ref[...]                     # [TM, LPAD] f32
    if emit_logits:
        logits_ref[...] = logits.astype(logits_ref.dtype)      # 128-lane unmasked

    # Cross entropy (f32): logsumexp over the real label columns only.
    col = jax.lax.broadcasted_iota(jnp.int32, logits.shape, 1)
    col_valid = col < num_labels
    masked = jnp.where(col_valid, logits, -1e30)
    mx = jnp.max(masked, axis=-1, keepdims=True)
    lse = jnp.log(jnp.sum(jnp.exp(masked - mx), axis=-1, keepdims=True)) + mx

    lab = lab_ref[...]                                         # [TM, 1] int32
    onehot = jnp.logical_and(col == lab, col_valid).astype(jnp.float32)
    picked = jnp.sum(onehot * logits, axis=-1, keepdims=True)  # [TM, 1]

    # Validity: inside the (possibly partial) last tile AND not ignore_index.
    row = jax.lax.broadcasted_iota(jnp.int32, lab.shape, 0) + pl.program_id(0) * tile_m
    valid = jnp.logical_and(row < n_rows,
                            jnp.logical_and(lab >= 0, lab < num_labels))
    per_token = jnp.where(valid, lse - picked, 0.0)            # (where, not *): kills
                                                               # NaNs from stale rows
    loss_sum = jnp.sum(per_token)
    cnt = jnp.sum(valid.astype(jnp.float32))

    # Pack (loss_sum, count) into one tiny per-tile output: row 0 = loss, row 1 = cnt.
    sel = jax.lax.broadcasted_iota(jnp.int32, part_ref.shape, 1)
    part_ref[...] = jnp.where(sel == 0, loss_sum, cnt)


def _choose_tile_m(n):
    if n <= 512:
        return _round_up(max(n, 16), 16)            # single tile for tiny inputs
    # >= 2 tiles so both v7x TensorCores get work; cap at 1024 rows (amortizes the
    # ~0.35us/step grid overhead on v5e/v6e while staying a few MiB in VMEM).
    return min(1024, _round_up(pl.cdiv(n, 2), 512))


def model_forward(input_ids, attention_mask, params, labels=None,
                  *, need_logits=True, logits_dtype=jnp.float32, trim_logits=True):
    """Mirrors ModelForSequenceLabeling.forward -> dict(loss=..., logits=...)."""
    B, S = input_ids.shape
    emb = params["embedding"]                        # bf16 [V, H]
    w_pad = params["cls_w_padded"]                   # bf16 [H, LPAD] (padded at init)
    b_pad = params["cls_b_padded"]                   # f32  [1, LPAD]
    H = emb.shape[1]
    L = params["cls_w"].shape[1]
    LPAD = w_pad.shape[1]
    N = B * S

    # --- synthetic deterministic "backbone" (plain-JAX glue): bf16 embedding
    # lookup only; the attention-mask multiply is fused into the Pallas kernel.
    hidden = emb[input_ids].reshape(N, H)                        # bf16, single pass
    mask = attention_mask.reshape(N, 1).astype(jnp.float32)

    TM = _choose_tile_m(N)
    num_tiles = pl.cdiv(N, TM)
    compute_loss = labels is not None
    emit_logits = bool(need_logits)

    h_spec = pl.BlockSpec((TM, H), lambda i: (i, 0))
    w_spec = pl.BlockSpec((H, LPAD), lambda i: (0, 0))           # grid-invariant
    b_spec = pl.BlockSpec((1, LPAD), lambda i: (0, 0))           # grid-invariant
    m_spec = pl.BlockSpec((TM, 1), lambda i: (i, 0))
    logits_shape = jax.ShapeDtypeStruct((N, LPAD), logits_dtype)
    logits_spec = pl.BlockSpec((TM, LPAD), lambda i: (i, 0))

    # VMEM budget: double-buffered streaming tiles + resident W/b, + ~4 MiB margin.
    lbytes = jnp.dtype(logits_dtype).itemsize if emit_logits else 0
    footprint = (2 * TM * H * 2            # hidden tiles (bf16, double-buffered)
                 + H * LPAD * 2            # weight (bf16, resident)
                 + LPAD * 4                # bias
                 + 2 * TM * 4              # mask tiles
                 + (2 * TM * 4 if compute_loss else 0)   # label tiles
                 + 2 * TM * LPAD * lbytes  # logits tiles
                 + 2 * 2 * LPAD * 4)       # packed loss/count partials
    vmem_limit = int(min(max(footprint + (4 << 20), 16 << 20), 32 << 20))
    cparams = pltpu.CompilerParams(dimension_semantics=("parallel",),
                                   vmem_limit_bytes=vmem_limit)

    loss = None
    logits_flat = None
    if compute_loss:
        lab = labels.reshape(N, 1).astype(jnp.int32)
        kernel = functools.partial(_head_ce_kernel, n_rows=N, tile_m=TM,
                                   num_labels=L, emit_logits=emit_logits)
        part_shape = jax.ShapeDtypeStruct((num_tiles, 2, LPAD), jnp.float32)
        part_spec = pl.BlockSpec((1, 2, LPAD), lambda i: (i, 0, 0))
        out_shape = (logits_shape, part_shape) if emit_logits else (part_shape,)
        out_specs = (logits_spec, part_spec) if emit_logits else (part_spec,)
        outs = pl.pallas_call(
            kernel,
            out_shape=out_shape,
            grid=(num_tiles,),
            in_specs=[h_spec, w_spec, b_spec, m_spec,
                      pl.BlockSpec((TM, 1), lambda i: (i, 0))],
            out_specs=out_specs,
            compiler_params=cparams,
        )(hidden, w_pad, b_pad, mask, lab)
        if emit_logits:
            logits_flat, part = outs
        else:
            (part,) = outs
        loss_sum = jnp.sum(part[:, 0, 0])
        cnt = jnp.sum(part[:, 1, 0])
        # NOTE: if every label is ignore_index this yields 0.0 (PyTorch returns NaN).
        loss = loss_sum / jnp.maximum(cnt, 1.0)
    else:
        logits_flat = pl.pallas_call(
            _head_logits_kernel,
            out_shape=logits_shape,
            grid=(num_tiles,),
            in_specs=[h_spec, w_spec, b_spec, m_spec],
            out_specs=logits_spec,
            compiler_params=cparams,
        )(hidden, w_pad, b_pad, mask)

    logits = None
    if logits_flat is not None:
        logits = logits_flat.reshape(B, S, LPAD)
        if trim_logits:
            # Narrow (non-128-lane) slice; pass trim_logits=False to keep the
            # lane-dense padded slab and slice lazily downstream.
            logits = logits[..., :L]
    return dict(loss=loss, logits=logits)


def init_params(key, vocab_size, hidden_size, num_labels):
    k_emb, k_w, k_b = jax.random.split(key, 3)
    lpad = _round_up(num_labels, _LANE)
    # config.aggregation != 'dm' -> scale = 1 -> Linear(hidden_size, num_labels)
    cls_w = jax.random.normal(k_w, (hidden_size, num_labels), jnp.float32) * 0.02
    cls_b = jax.random.normal(k_b, (num_labels,), jnp.float32) * 0.02
    return {
        # bf16 table: the backbone gather emits bf16 hidden directly (no extra cast pass)
        "embedding": (jax.random.normal(k_emb, (vocab_size, hidden_size), jnp.float32)
                      * 0.02).astype(jnp.bfloat16),
        "cls_w": cls_w,
        "cls_b": cls_b,
        # pad/cast once at init: grid-invariant, VMEM-resident inside the kernel
        "cls_w_padded": jnp.zeros((hidden_size, lpad), jnp.bfloat16)
                        .at[:, :num_labels].set(cls_w.astype(jnp.bfloat16)),
        "cls_b_padded": jnp.zeros((1, lpad), jnp.float32).at[0, :num_labels].set(cls_b),
    }


def _reference_forward(input_ids, attention_mask, params, labels):
    """Pure-JAX reference (f32) with PyTorch CrossEntropyLoss semantics."""
    hidden = (params["embedding"][input_ids].astype(jnp.float32)
              * attention_mask[..., None].astype(jnp.float32))
    logits = hidden @ params["cls_w"] + params["cls_b"]
    flat = logits.reshape(-1, logits.shape[-1])
    lab = labels.reshape(-1)
    lse = jax.nn.logsumexp(flat, axis=-1)
    valid = lab != IGNORE_INDEX
    safe_lab = jnp.where(valid, lab, 0)
    picked = jnp.take_along_axis(flat, safe_lab[:, None], axis=-1)[:, 0]
    per_tok = (lse - picked) * valid
    loss = jnp.sum(per_tok) / jnp.maximum(jnp.sum(valid), 1)
    return loss, logits


if __name__ == "__main__":
    B, S, H, L, VOCAB = 2, 8, 32, 8, 30

    key = jax.random.PRNGKey(0)
    k_params, k_ids, k_lab = jax.random.split(key, 3)

    params = init_params(k_params, VOCAB, H, L)
    input_ids = jax.random.randint(k_ids, (B, S), 0, VOCAB, dtype=jnp.int32)
    attention_mask = jnp.ones((B, S), dtype=jnp.int32)
    labels = jax.random.randint(k_lab, (B, S), 0, L, dtype=jnp.int32)
    # exercise PyTorch-style ignore_index padding on a couple of tokens
    labels = labels.at[0, S - 1].set(IGNORE_INDEX).at[1, S - 1].set(IGNORE_INDEX)

    ref_loss, ref_logits = _reference_forward(input_ids, attention_mask, params, labels)

    # Training path: fused Linear + CE, logits returned.
    out = model_forward(input_ids, attention_mask, params, labels=labels)
    logits = jax.block_until_ready(out["logits"])
    loss = jax.block_until_ready(out["loss"])
    assert logits.shape == (B, S, L)
    assert bool(jnp.all(jnp.isfinite(logits))) and bool(jnp.isfinite(loss))
    assert jnp.allclose(logits, ref_logits, rtol=2e-2, atol=1e-3)
    assert jnp.allclose(loss, ref_loss, rtol=2e-2, atol=1e-3)

    # Loss-only training-step path (skips the logits writeback entirely).
    out_loss_only = model_forward(input_ids, attention_mask, params, labels=labels,
                                  need_logits=False)
    loss2 = jax.block_until_ready(out_loss_only["loss"])
    assert out_loss_only["logits"] is None
    assert jnp.allclose(loss2, ref_loss, rtol=2e-2, atol=1e-3)

    # Inference path (labels is None): logits only, no CE math.
    out_inf = model_forward(input_ids, attention_mask, params)
    logits_inf = jax.block_until_ready(out_inf["logits"])
    assert out_inf["loss"] is None
    assert jnp.allclose(logits_inf, ref_logits, rtol=2e-2, atol=1e-3)

    print("KERNEL_OK")
</pallas_src>

<mosaic_0001>
module attributes {stable_mosaic.version = 11 : i64} {
  func.func @_head_ce_kernel(%arg0: i32, %arg1: memref<16x32xbf16, #tpu.memory_space<vmem>>, %arg2: memref<32x128xbf16, #tpu.memory_space<vmem>>, %arg3: memref<1x128xf32, #tpu.memory_space<vmem>>, %arg4: memref<16x1xf32, #tpu.memory_space<vmem>>, %arg5: memref<16x1xi32, #tpu.memory_space<vmem>>, %arg6: memref<16x128xf32, #tpu.memory_space<vmem>>, %arg7: memref<1x2x128xf32, #tpu.memory_space<vmem>>) attributes {dimension_semantics = [#tpu.dimension_semantics<parallel>], iteration_bounds = array<i64: 1>, scalar_prefetch = 0 : i64, scratch_operands = 0 : i64, tpu.core_type = #tpu.core_type<tc>, window_params = [{transform_indices = @transform_0, window_bounds = array<i64: 16, 32>}, {pipeline_mode = #tpu.pipeline_mode<synchronous>, transform_indices = @transform_1, window_bounds = array<i64: 32, 128>}, {pipeline_mode = #tpu.pipeline_mode<synchronous>, transform_indices = @transform_2, window_bounds = array<i64: 1, 128>}, {transform_indices = @transform_3, window_bounds = array<i64: 16, 1>}, {transform_indices = @transform_4, window_bounds = array<i64: 16, 1>}, {transform_indices = @transform_5, window_bounds = array<i64: 16, 128>}, {transform_indices = @transform_6, window_bounds = array<i64: 1, 2, 128>}]} {
    %c0 = arith.constant 0 : index
    %c0_0 = arith.constant 0 : index
    %0 = vector.load %arg1[%c0, %c0_0] : memref<16x32xbf16, #tpu.memory_space<vmem>>, vector<16x32xbf16>
    %c0_1 = arith.constant 0 : index
    %c0_2 = arith.constant 0 : index
    %1 = vector.load %arg2[%c0_1, %c0_2] : memref<32x128xbf16, #tpu.memory_space<vmem>>, vector<32x128xbf16>
    %cst = arith.constant dense<0.000000e+00> : vector<16x128xf32>
    %2 = tpu.matmul %0, %1, %cst {dimension_numbers = #tpu.dot_dimension_numbers<[1], [0], [0], [1], [0, 0, 1, 1], [], []>} : vector<16x32xbf16>, vector<32x128xbf16>, vector<16x128xf32> -> vector<16x128xf32>
    %c0_3 = arith.constant 0 : index
    %c0_4 = arith.constant 0 : index
    %3 = vector.load %arg4[%c0_3, %c0_4] : memref<16x1xf32, #tpu.memory_space<vmem>>, vector<16x1xf32>
    %4 = vector.broadcast %3 : vector<16x1xf32> to vector<16x128xf32>
    %5 = arith.mulf %4, %2 : vector<16x128xf32>
    %c0_5 = arith.constant 0 : index
    %c0_6 = arith.constant 0 : index
    %6 = vector.load %arg3[%c0_5, %c0_6] : memref<1x128xf32, #tpu.memory_space<vmem>>, vector<1x128xf32>
    %7 = vector.broadcast %6 : vector<1x128xf32> to vector<16x128xf32>
    %8 = arith.addf %5, %7 : vector<16x128xf32>
    %c0_7 = arith.constant 0 : index
    %c0_8 = arith.constant 0 : index
    %9 = vector.load %arg6[%c0_7, %c0_8] : memref<16x128xf32, #tpu.memory_space<vmem>>, vector<16x128xf32>
    tpu.vector_store %arg6[%c0_7, %c0_8], %8 {strides = array<i32>} : memref<16x128xf32, #tpu.memory_space<vmem>>, vector<16x128xf32>,
    %10 = tpu.iota {dimensions = array<i32: 1>} : vector<16x128xi32>
    %c8_i32 = arith.constant 8 : i32
    %11 = vector.broadcast %c8_i32 : i32 to vector<16x128xi32>
    %12 = arith.cmpi slt, %10, %11 : vector<16x128xi32>
    %cst_9 = arith.constant -1.000000e+30 : f32
    %13 = vector.broadcast %cst_9 : f32 to vector<16x128xf32>
    %14 = arith.select %12, %8, %13 : vector<16x128xi1>, vector<16x128xf32>
    %cst_10 = arith.constant dense<0xFF800000> : vector<16xf32>
    %15 = vector.multi_reduction <maximumf>, %14, %cst_10 [1] : vector<16x128xf32> to vector<16xf32>
    %16 = vector.shape_cast %15 : vector<16xf32> to vector<16x1xf32>
    %17 = vector.broadcast %16 : vector<16x1xf32> to vector<16x128xf32>
    %18 = arith.subf %14, %17 : vector<16x128xf32>
    %19 = math.exp %18 : vector<16x128xf32>
    %cst_11 = arith.constant dense<0.000000e+00> : vector<16xf32>
    %20 = vector.multi_reduction <add>, %19, %cst_11 [1] : vector<16x128xf32> to vector<16xf32>
    %21 = vector.shape_cast %20 : vector<16xf32> to vector<16x1xf32>
    %22 = math.log %21 : vector<16x1xf32>
    %23 = arith.addf %22, %16 : vector<16x1xf32>
    %c0_12 = arith.constant 0 : index
    %c0_13 = arith.constant 0 : index
    %24 = vector.load %arg5[%c0_12, %c0_13] : memref<16x1xi32, #tpu.memory_space<vmem>>, vector<16x1xi32>
    %25 = vector.broadcast %24 : vector<16x1xi32> to vector<16x128xi32>
    %26 = arith.cmpi eq, %10, %25 : vector<16x128xi32>
    %27 = arith.andi %26, %12 : vector<16x128xi1>
    %28 = arith.extui %27 : vector<16x128xi1> to vector<16x128xi32>
    %29 = arith.sitofp %28 : vector<16x128xi32> to vector<16x128xf32>
    %30 = arith.mulf %29, %8 : vector<16x128xf32>
    %cst_14 = arith.constant dense<0.000000e+00> : vector<16xf32>
    %31 = vector.multi_reduction <add>, %30, %cst_14 [1] : vector<16x128xf32> to vector<16xf32>
    %32 = vector.shape_cast %31 : vector<16xf32> to vector<16x1xf32>
    %33 = tpu.iota {dimensions = array<i32: 0>} : vector<16x1xi32>
    %c16_i32 = arith.constant 16 : i32
    %34 = arith.muli %arg0, %c16_i32 : i32
    %35 = vector.broadcast %34 : i32 to vector<16x1xi32>
    %36 = arith.addi %33, %35 : vector<16x1xi32>
    %c16_i32_15 = arith.constant 16 : i32
    %37 = vector.broadcast %c16_i32_15 : i32 to vector<16x1xi32>
    %38 = arith.cmpi slt, %36, %37 : vector<16x1xi32>
    %c0_i32 = arith.constant 0 : i32
    %39 = vector.broadcast %c0_i32 : i32 to vector<16x1xi32>
    %40 = arith.cmpi sge, %24, %39 : vector<16x1xi32>
    %c8_i32_16 = arith.constant 8 : i32
    %41 = vector.broadcast %c8_i32_16 : i32 to vector<16x1xi32>
    %42 = arith.cmpi slt, %24, %41 : vector<16x1xi32>
    %43 = arith.andi %40, %42 : vector<16x1xi1>
    %44 = arith.andi %38, %43 : vector<16x1xi1>
    %45 = arith.subf %23, %32 : vector<16x1xf32>
    %cst_17 = arith.constant 0.000000e+00 : f32
    %46 = vector.broadcast %cst_17 : f32 to vector<16x1xf32>
    %47 = arith.select %44, %45, %46 : vector<16x1xi1>, vector<16x1xf32>
    %48 = vector.shape_cast %47 : vector<16x1xf32> to vector<1x16x1xf32>
    %cst_18 = arith.constant dense<0.000000e+00> : vector<1xf32>
    %49 = vector.multi_reduction <add>, %48, %cst_18 [1, 2] : vector<1x16x1xf32> to vector<1xf32>
    %50 = vector.shape_cast %49 : vector<1xf32> to vector<1x1x1xf32>
    %51 = vector.extract %50[0, 0, 0] : f32 from vector<1x1x1xf32>
    %52 = arith.extui %44 : vector<16x1xi1> to vector<16x1xi32>
    %53 = arith.sitofp %52 : vector<16x1xi32> to vector<16x1xf32>
    %54 = vector.shape_cast %53 : vector<16x1xf32> to vector<1x16x1xf32>
    %cst_19 = arith.constant dense<0.000000e+00> : vector<1xf32>
    %55 = vector.multi_reduction <add>, %54, %cst_19 [1, 2] : vector<1x16x1xf32> to vector<1xf32>
    %56 = vector.shape_cast %55 : vector<1xf32> to vector<1x1x1xf32>
    %57 = vector.extract %56[0, 0, 0] : f32 from vector<1x1x1xf32>
    %58 = tpu.iota {dimensions = array<i32: 1>} : vector<1x2x128xi32>
    %c0_i32_20 = arith.constant 0 : i32
    %59 = vector.broadcast %c0_i32_20 : i32 to vector<1x2x128xi32>
    %60 = arith.cmpi eq, %58, %59 : vector<1x2x128xi32>
    %61 = vector.broadcast %51 : f32 to vector<1x2x128xf32>
    %62 = vector.broadcast %57 : f32 to vector<1x2x128xf32>
    %63 = arith.select %60, %61, %62 : vector<1x2x128xi1>, vector<1x2x128xf32>
    %c0_21 = arith.constant 0 : index
    %c0_22 = arith.constant 0 : index
    %c0_23 = arith.constant 0 : index
    %64 = vector.load %arg7[%c0_21, %c0_22, %c0_23] : memref<1x2x128xf32, #tpu.memory_space<vmem>>, vector<1x2x128xf32>
    tpu.vector_store %arg7[%c0_21, %c0_22, %c0_23], %63 {strides = array<i32>} : memref<1x2x128xf32, #tpu.memory_space<vmem>>, vector<1x2x128xf32>,
    return
  }
  func.func @transform_0(%arg0: i32) -> (i32, i32) {
    %c0_i32 = arith.constant 0 : i32
    %c0_i32_0 = arith.constant 0 : i32
    return %arg0, %c0_i32 : i32, i32
  }
  func.func @transform_1(%arg0: i32) -> (i32, i32) {
    %c0_i32 = arith.constant 0 : i32
    %c0_i32_0 = arith.constant 0 : i32
    %c0_i32_1 = arith.constant 0 : i32
    return %c0_i32, %c0_i32_0 : i32, i32
  }
  func.func @transform_2(%arg0: i32) -> (i32, i32) {
    %c0_i32 = arith.constant 0 : i32
    %c0_i32_0 = arith.constant 0 : i32
    %c0_i32_1 = arith.constant 0 : i32
    return %c0_i32, %c0_i32_0 : i32, i32
  }
  func.func @transform_3(%arg0: i32) -> (i32, i32) {
    %c0_i32 = arith.constant 0 : i32
    %c0_i32_0 = arith.constant 0 : i32
    return %arg0, %c0_i32 : i32, i32
  }
  func.func @transform_4(%arg0: i32) -> (i32, i32) {
    %c0_i32 = arith.constant 0 : i32
    %c0_i32_0 = arith.constant 0 : i32
    return %arg0, %c0_i32 : i32, i32
  }
  func.func @transform_5(%arg0: i32) -> (i32, i32) {
    %c0_i32 = arith.constant 0 : i32
    %c0_i32_0 = arith.constant 0 : i32
    return %arg0, %c0_i32 : i32, i32
  }
  func.func @transform_6(%arg0: i32) -> (i32, i32, i32) {
    %c0_i32 = arith.constant 0 : i32
    %c0_i32_0 = arith.constant 0 : i32
    %c0_i32_1 = arith.constant 0 : i32
    return %arg0, %c0_i32, %c0_i32_0 : i32, i32, i32
  }
}

</mosaic_0001>

<bundles_post_ra>
// kernel: tpu_custom_call.1
= control target key start
LH: loop header
LB: loop body
LE: loop exit
PB: predicated region body
PF: predicated region fallthrough
CT: control target
= control target key end

     0   :  { %12 = vsyncpa [#allocation3], 0  ;;  %v342_v1 = vmov 0.0   ;;  %vm343_vm0 = vmmov 0   ;;  %v344_v4 = vmov 0   ;;  %s450_s0 = inlined_call_operand.vmem [shape: bf16[16,32], index: 0, kind: input, shape index: {}]   ;;  %s451_s1 = inlined_call_operand.vmem [shape: bf16[32,128], index: 1, kind: input, shape index: {}]   ;;  %s452_s2 = inlined_call_operand.vmem [shape: f32[1,128], index: 2, kind: input, shape index: {}]   ;;  %s453_s3 = inlined_call_operand.vmem [shape: f32[16,1], index: 3, kind: input, shape index: {}]   ;;  %s454_s4 = inlined_call_operand.vmem [shape: s32[16,1], index: 4, kind: input, shape index: {}]   ;;  %s455_s5 = inlined_call_operand.hbm [shape: f32[16,128], index: 5, kind: output, shape index: {0}]   ;;  %s456_s6 = inlined_call_operand.hbm [shape: f32[1,2,128], index: 6, kind: output, shape index: {1}]  }
   0x1   :  { %v283_v0 = vld [vmem:[%s451_s1] sm:$0xff]   ;;  %262 = vmatprep.subr.bf16.mxu0 %v342_v1  ;;  %v284_v2 = vld [vmem:[%s451_s1 + $0x8] sm:$0xff]   ;;  %266 = vmatprep.mubr.msk.bf16.mxu0 %vm343_vm0, %v342_v1 }
   0x2   :  { %263 = vmatpush3.bf16.msra.mxu0 %v283_v0  ;;  %v93_v3 = vld [vmem:[%s453_s3] sm:$0xff]  ;;  %281 = vset.pattern.permute.xlu0 %v344_v4 }
   0x3   :  { %264 = vmatprep.subr.bf16.mxu0 %v342_v1  ;;  %282 = vset.pattern.permute.xlu1 %v344_v4 }
   0x4   :  { %13 = vsyncpa [#allocation5], 0  ;;  %v285_v5 = vld [vmem:[%s450_s0] sm:$0xff]   ;;  %97 = vperm.xlu0 %281, %v93_v3   ;;  %vm48_vm1 = vcmask 261120   ;;  %v94_v6 = vld [vmem:[%s453_s3 + $0x8] sm:$0xff]  ;;  %v118_v9 = vlaneseq  ;;  %vm186_vm13 = vcmask 7168  }
   0x5   :  { %v405_v7 = vld [vmem:[%s454_s4] sm:$0xff]  ;;  %v144_v23 = vld [vmem:[%s454_s4 + $0x8] sm:$0xff] }
   0x6   :  { %265 = vmatpush3.bf16.msra.mxu0 %v284_v2  ;;  %v119_v10 = vand.u32 127, %v118_v9  ;;  %v254_v12 = vld [vmem:[%s452_s2] ss:$0 sm:$0xff]  ;;  %vm174_vm7 = vcmp.ge.s32.totalorder %v405_v7, 0  ;;  %vm176_vm8 = vcmp.lt.s32.totalorder %v405_v7, 8  ;;  %vm175_vm9 = vcmp.ge.s32.totalorder %v144_v23, 0 }
   0x7   :  { %vm177_vm10 = vcmp.lt.s32.totalorder %v144_v23, 8  ;;  %vm178_vm11 = vmand %vm174_vm7, %vm176_vm8  ;;  %s345_s2 = smov [#allocation2]  }
   0x8   :  { %102 = vperm.xlu0 %281, %v94_v6   ;;  %vm120_vm2 = vcmp.lt.s32.totalorder %v119_v10, 8  ;;  %vm179_vm12 = vmand %vm175_vm9, %vm177_vm10  ;;  %v257_v51 = vsel %vm178_vm11, 1.0, %v342_v1  ;;  %s225_s4 = sshll.u32 %s345_s2, 4  ;;  %s226_s4 = int_to_ptr.vmem [resolvable:$true] %s225_s4 }
   0x9   :  { %267 = vmatmul.mubr.msk.bf16.vlgmr.msra.gmra.mrb[0].mxu0 %vm48_vm1, %v285_v5  ;;  %v258_v52 = vsel %vm179_vm12, 1.0, %v342_v1  ;;  %v203_v56 = vsel %vm186_vm13, %v257_v51, 0.0  ;;  %s294_s10 = scalar_lea.vmem %s226_s4, 256  ;;  %p299_p1 = scmp.lt.s32.totalorder %s226_s4, %s226_s4 }
   0xa   :  { %v204_v57 = vsel %vm186_vm13, %v258_v52, 0.0  ;;  %p295_p0 = scmp.ne.s32.totalorder %s226_s4, %s294_s10  ;;  %p300_p2 = scmp.lt.s32.totalorder %s294_s10, %s294_s10 }
   0xb   :  { %v205_v59 = vadd.f32 %v204_v57, %v203_v56 }
   0xc   :  { %146 = vperm.xlu0 %281, %v405_v7   ;;  %p301_p3 = por %p300_p2, %p299_p1 }
   0xe   :  { %p302_p4 = pnand %p301_p3, %p295_p0 }
  0x83   :  { %v98_v8 = vpop.permute.xlu0 %97 }
  0x87   :  { %v103_v15 = vpop.permute.xlu0 %102 }
  0x8b   :  { %v147_v29 = vpop.permute.xlu0 %146 }
  0x8c   :  { %vm151_vm3 = vcmp.eq.s32.totalorder %v119_v10, %v147_v29 }
  0x8d   :  { %vm153_vm4 = vmand %vm151_vm3, %vm120_vm2 }
  0x8e   :  { %v255_v33 = vsel %vm153_vm4, 1.0, %v342_v1 }
  0xdc   :  { %v86_v11 = vpop.f32.mrb[0].mxu0 }
  0xdd   :  { %v105_v13 = vmul.f32 %v98_v8, %v86_v11  ;;  %v268_v14 = vpop.f32.mrb[1].mxu0 }
  0xde   :  { %v89_v16 = vpop.f32.mrb[2].mxu0 }
  0xdf   :  { %v114_v17 = vadd.f32 %v254_v12, %v105_v13  ;;  %v106_v18 = vmul.f32 %v103_v15, %v89_v16  ;;  %v269_v19 = vpop.f32.mrb[3].mxu0 }
  0xe1   :  { %116 = vst [vmem:[#allocation2] sm:$0xff] %v114_v17  ;;  %v115_v20 = vadd.f32 %v254_v12, %v106_v18  ;;  %v121_v21 = vsel %vm120_vm2, %v114_v17, -1e+30  ;;  %v159_v34 = vmul.f32 %v255_v33, %v114_v17 }
  0xe2   :  { %123 = vmax.xlane.f32.xlu1 %v121_v21 }
  0xe3   :  { %117 = vst [vmem:[#allocation2 + $0x8] sm:$0xff] %v115_v20  ;;  %v122_v22 = vsel %vm120_vm2, %v115_v20, -1e+30 }
  0xe6   :  { %125 = vmax.xlane.f32.xlu1 %v122_v22 }
  0xf7   :  { %149 = vperm.xlu1 %282, %v144_v23  }
 0x16f   :  { %v124_v24 = vpop.xlane.xlu1 %123 }
 0x170   :  { %v127_v25 = vsub.f32 %v121_v21, %v124_v24 }
 0x172   :  { %v129_v26 = vmul.f32 1.442695, %v127_v25 }
 0x173   :  { %v126_v27 = vpop.xlane.xlu1 %125 }
 0x174   :  { %286 = vpow2.f32 %v129_v26  ;;  %v128_v28 = vsub.f32 %v122_v22, %v126_v27 }
 0x176   :  { %v131_v30 = vmul.f32 1.442695, %v128_v28 }
 0x177   :  { %v150_v31 = vpop.permute.xlu1 %149 }
 0x178   :  { %288 = vpow2.f32 %v131_v30  ;;  %vm152_vm5 = vcmp.eq.s32.totalorder %v119_v10, %v150_v31 }
 0x179   :  { %vm154_vm6 = vmand %vm152_vm5, %vm120_vm2 }
 0x17a   :  { %v256_v36 = vsel %vm154_vm6, 1.0, %v342_v1 }
 0x17b   :  { %v160_v37 = vmul.f32 %v256_v36, %v115_v20 }
 0x17e   :  { %v287_v32 = vpop.eup %286 }
 0x17f   :  { %133 = vadd.xlane.f32.xlu0 %v287_v32 }
 0x182   :  { %v289_v35 = vpop.eup %288 }
 0x183   :  { %161 = vadd.xlane.f32.xlu0 %v159_v34  ;;  %135 = vadd.xlane.f32.xlu1 %v289_v35 }
 0x187   :  { %163 = vadd.xlane.f32.xlu0 %v160_v37 }
 0x20c   :  { %v134_v38 = vpop.xlane.xlu0 %133 }
 0x20d   :  { %290 = vlog2.f32 %v134_v38 }
 0x210   :  { %v136_v39 = vpop.xlane.xlu1 %135  ;;  %v162_v42 = vpop.xlane.xlu0 %161 }
 0x211   :  { %292 = vlog2.f32 %v136_v39 }
 0x214   :  { %v164_v48 = vpop.xlane.xlu0 %163 }
 0x217   :  { %v291_v40 = vpop.eup %290 }
 0x218   :  { %v138_v41 = vmul.f32 0.6931472, %v291_v40 }
 0x21a   :  { %v141_v43 = vadd.f32 %v138_v41, %v124_v24 }
 0x21b   :  { %v293_v44 = vpop.eup %292 }
 0x21c   :  { %v182_v45 = vsub.f32 %v141_v43, %v162_v42  ;;  %v140_v46 = vmul.f32 0.6931472, %v293_v44 }
 0x21e   :  { %v142_v47 = vadd.f32 %v140_v46, %v126_v27  ;;  %v184_v49 = vsel %vm178_vm11, %v182_v45, 0.0 }
 0x21f   :  { %v187_v54 = vsel %vm186_vm13, %v184_v49, 0.0 }
 0x220   :  { %v183_v50 = vsub.f32 %v142_v47, %v164_v48 }
 0x222   :  { %v185_v53 = vsel %vm179_vm12, %v183_v50, 0.0 }
 0x223   :  { %v188_v55 = vsel %vm186_vm13, %v185_v53, 0.0 }
 0x224   :  { %v189_v58 = vadd.f32 %v188_v55, %v187_v54 }
 0x226   :  { %190 = vadd.xlane.f32.xlu0 %v189_v58 }
 0x22a   :  { %206 = vadd.xlane.f32.xlu0 %v205_v59 }
 0x22b   :  { %305 = shalt.err (!%p302_p4)
}
 0x22c   :  { %s306_s13 = scalar_lea.hbm %s455_s5, 256 }
 0x22d   :  { %p307_p5 = scmp.ne.s32.totalorder %s455_s5, %s306_s13  ;;  %p310_p6 = scmp.lt.u32.totalorder %s306_s13, %s455_s5 }
 0x22f   :  { %p312_p7 = pnand %p310_p6, %p307_p5 }
 0x231   :  { %315 = shalt.err (!%p312_p7)
}
 0x232   :  { %s346_s18 = smov 128   ;;  %s347_s19 = smov 8   ;;  %v166_v11 = vshrl.u32 %v118_v9, 7 }
 0x233   :  { %231 = dma.vmem_to_hbm [thread:$0]  %s226_s4, 256, %s455_s5, [#allocation3], %s346_s18, %s346_s18, %s347_s19  }
 0x234   :  { %s348_s5 = smov [#allocation4]   ;;  %vm215_vm14 = vcmp.eq.s32.totalorder %v166_v11, 0 }
 0x235   :  { %s238_s23 = sshll.u32 %s348_s5, 4  ;;  %s239_s23 = int_to_ptr.vmem [resolvable:$true] %s238_s23 }
 0x236   :  { %s316_s25 = scalar_lea.vmem %s239_s23, 32  ;;  %p321_p9 = scmp.lt.s32.totalorder %s239_s23, %s239_s23 }
 0x237   :  { %p317_p8 = scmp.ne.s32.totalorder %s239_s23, %s316_s25  ;;  %p322_p10 = scmp.lt.s32.totalorder %s316_s25, %s316_s25 }
 0x239   :  { %p323_p11 = por %p322_p10, %p321_p9 }
 0x23b   :  { %p324_p12 = pnand %p323_p11, %p317_p8 }
 0x2b3   :  { %v191_v60 = vpop.xlane.xlu0 %190 }
 0x2b4   :  { %v192_v61 = vrot.slane %v191_v60, 4 }
 0x2b6   :  { %v193_v62 = vadd.f32 %v192_v61, %v191_v60 }
 0x2b7   :  { %v207_v63 = vpop.xlane.xlu0 %206 }
 0x2b8   :  { %v194_v0 = vrot.slane %v193_v62, 2  ;;  %v208_v1 = vrot.slane %v207_v63, 4 }
 0x2ba   :  { %v209_v2 = vadd.f32 %v208_v1, %v207_v63  ;;  %v195_v3 = vadd.f32 %v194_v0, %v193_v62 }
 0x2bc   :  { %v210_v4 = vrot.slane %v209_v2, 2  ;;  %v196_v5 = vrot.slane %v195_v3, 1 }
 0x2be   :  { %v211_v6 = vadd.f32 %v210_v4, %v209_v2  ;;  %v197_v7 = vadd.f32 %v196_v5, %v195_v3 }
 0x2c0   :  { %270 = vpush %v197_v7  ;;  %v212_v8 = vrot.slane %v211_v6, 1 }
 0x2c2   :  { %v213_v10 = vadd.f32 %v212_v8, %v211_v6 }
 0x2c4   :  { %272 = vpush %v213_v10 }
 0x2f1   :  { %s271_s22 = spop %270 }
 0x2f2   :  { %v216_v12 = vstv %s271_s22 }
 0x2f5   :  { %s273_s24 = spop %272 }
 0x2f6   :  { %v217_v13 = vstv %s273_s24 }
 0x2f7   :  { %v218_v14 = vsel %vm215_vm14, %v216_v12, %v217_v13 }
 0x2f8   :  { %219 = vst [vmem:[#allocation4] sm:$0x3] %v218_v14 }
 0x2f9   :  { %327 = shalt.err (!%p324_p12)
}
 0x2fa   :  { %s328_s28 = scalar_lea.hbm %s456_s6, 32 }
 0x2fb   :  { %p329_p13 = scmp.ne.s32.totalorder %s456_s6, %s328_s28  ;;  %p332_p0 = scmp.lt.u32.totalorder %s328_s28, %s456_s6 }
 0x2fd   :  { %p334_p1 = pnand %p332_p0, %p329_p13 }
 0x2ff   :  { %337 = shalt.err (!%p334_p1)
}
 0x300   :  { %241 = dma.vmem_to_hbm [thread:$0]  %s239_s23, 32, %s456_s6, [#allocation5]  }
 0x301   :  { %338 = dma.done.wait [#allocation3], 256  }
 0x302   :  { %339 = vsyncadd [#allocation3], 4294967040 }
 0x303   :  { %340 = dma.done.wait [#allocation5], 32  }
 0x304   :  { %341 = vsyncadd [#allocation5], 4294967264 }
 0x305   :  { %248 = vsyncpa [#allocation3], 1 }
 0x306   :  { %249 = vsyncpa [#allocation5], 1 }

</bundles_post_ra>
